<compile_context>
chip_gen: v7x
topology: tpu7x:2x2x1
jax: 0.10.0
libtpu: 0.0.40
codegen_flags: <defaults>
</compile_context>

<pallas_src>
import functools

import jax
import jax.numpy as jnp
from jax.experimental import pallas as pl
from jax.experimental.pallas import tpu as pltpu

EPS = 1e-5

# 3 streams x 2 pipeline buffers of (row_tile, hw) must stay under this.
_VMEM_BUFFER_BUDGET = 24 * 1024 * 1024
# Explicit scoped-VMEM limit: > v5e (16 MiB) / v6e (32 MiB) defaults,
# comfortably under v7x's 64 MiB physical VMEM per TensorCore.
_VMEM_LIMIT_BYTES = 48 * 1024 * 1024


def _sublane_packing(itemsize: int) -> int:
    # 8 rows for f32, 16 for bf16, 32 for int8/fp8 (packed sublane tiles).
    return max(8, 32 // itemsize)


def _round_up(x: int, m: int) -> int:
    return -(-x // m) * m


def _pick_row_tile(rows: int, hw: int, itemsize: int, packing: int) -> int:
    # Budget accounts for lane-layout padding of the last dim to 128.
    hw_lanes = _round_up(hw, 128)
    bytes_per_row = 3 * 2 * hw_lanes * itemsize  # 3 arrays, double-buffered
    max_rows = _VMEM_BUFFER_BUDGET // bytes_per_row
    max_rows = max(packing, (max_rows // packing) * packing)
    return min(max_rows, _round_up(rows, packing))


def _adain_kernel(c_ref, s_ref, o_ref, *, eps, hw):
    # c_ref / s_ref / o_ref: (ROW_TILE, HW) blocks in VMEM. HW is the full
    # logical spatial extent, so lane reductions need no explicit masking.
    c = c_ref[...].astype(jnp.float32)
    s = s_ref[...].astype(jnp.float32)

    inv_n = jnp.float32(1.0 / hw)
    inv_nm1 = jnp.float32(1.0 / (hw - 1))

    def mean_std(x):
        m = jnp.sum(x, axis=-1, keepdims=True) * inv_n
        d = x - m
        var = jnp.sum(d * d, axis=-1, keepdims=True) * inv_nm1  # unbiased (ddof=1)
        return m, jnp.sqrt(var) + eps

    c_mean, c_std = mean_std(c)
    s_mean, s_std = mean_std(s)

    # Per-row affine; exact divide keeps torch's eps ordering bit-consistent
    # (scale = (sqrt(var_s)+eps) / (sqrt(var_c)+eps)). One divide per row only.
    scale = s_std / c_std
    bias = s_mean - c_mean * scale
    o_ref[...] = (c * scale + bias).astype(o_ref.dtype)


def simple_adain(content, style, *, eps=EPS):
    assert content.shape == style.shape, "content/style must share a shape"
    n, c, h, w = content.shape
    rows, hw = n * c, h * w
    assert hw > 1, "unbiased std (ddof=1) is undefined for a single spatial element"

    itemsize = jnp.dtype(content.dtype).itemsize
    packing = _sublane_packing(itemsize)
    row_tile = _pick_row_tile(rows, hw, itemsize, packing)
    grid = (pl.cdiv(rows, row_tile),)

    c2 = content.reshape(rows, hw)
    s2 = style.reshape(rows, hw)

    kernel = functools.partial(_adain_kernel, eps=eps, hw=hw)

    out = pl.pallas_call(
        kernel,
        out_shape=jax.ShapeDtypeStruct((rows, hw), content.dtype),
        grid_spec=pltpu.PrefetchScalarGridSpec(
            num_scalar_prefetch=0,
            grid=grid,
            in_specs=[
                pl.BlockSpec((row_tile, hw), lambda i: (i, 0)),
                pl.BlockSpec((row_tile, hw), lambda i: (i, 0)),
            ],
            out_specs=pl.BlockSpec((row_tile, hw), lambda i: (i, 0)),
        ),
        compiler_params=pltpu.CompilerParams(
            dimension_semantics=("parallel",),
            vmem_limit_bytes=_VMEM_LIMIT_BYTES,
        ),
        cost_estimate=pl.CostEstimate(
            flops=10 * rows * hw,
            transcendentals=4 * rows,
            bytes_accessed=3 * rows * hw * itemsize,
        ),
    )(c2, s2)

    return out.reshape(n, c, h, w)


def _reference_adain(content, style, eps=EPS):
    # Pure-JAX reference mirroring the PyTorch module exactly.
    def mean_std(x):
        m = jnp.mean(x, axis=(2, 3), keepdims=True)
        sd = jnp.std(x, axis=(2, 3), keepdims=True, ddof=1) + eps
        return m, sd

    cm, cs = mean_std(content)
    sm, ss = mean_std(style)
    return ((content - cm) / cs) * ss + sm


if __name__ == "__main__":
    key = jax.random.PRNGKey(0)
    k1, k2, k3, k4 = jax.random.split(key, 4)

    # Primary check: NCHW shapes consistent with the forward pass.
    content = jax.random.normal(k1, (2, 4, 16, 16), dtype=jnp.float32)
    style = 2.5 * jax.random.normal(k2, (2, 4, 16, 16), dtype=jnp.float32) + 1.0

    out = jax.block_until_ready(simple_adain(content, style))
    ref = _reference_adain(content, style)
    assert out.shape == ref.shape and out.dtype == ref.dtype
    assert jnp.allclose(out, ref, atol=2e-5, rtol=2e-5), "mismatch vs reference"

    # Secondary check: H*W not a multiple of 128 exercises the non-lane-aligned path.
    content_b = jax.random.normal(k3, (2, 4, 14, 14), dtype=jnp.float32)
    style_b = 1.5 * jax.random.normal(k4, (2, 4, 14, 14), dtype=jnp.float32) - 0.5

    out_b = jax.block_until_ready(simple_adain(content_b, style_b))
    ref_b = _reference_adain(content_b, style_b)
    assert out_b.shape == ref_b.shape and out_b.dtype == ref_b.dtype
    assert jnp.allclose(out_b, ref_b, atol=2e-5, rtol=2e-5), "mismatch (non-aligned path)"

    print("KERNEL_OK")
</pallas_src>

<mosaic_0001>
module attributes {stable_mosaic.version = 11 : i64} {
  func.func @_adain_kernel(%arg0: i32, %arg1: memref<8x256xf32, #tpu.memory_space<vmem>>, %arg2: memref<8x256xf32, #tpu.memory_space<vmem>>, %arg3: memref<8x256xf32, #tpu.memory_space<vmem>>) attributes {dimension_semantics = [#tpu.dimension_semantics<parallel>], iteration_bounds = array<i64: 1>, scalar_prefetch = 0 : i64, scratch_operands = 0 : i64, tpu.core_type = #tpu.core_type<tc>, window_params = [{transform_indices = @transform_0, window_bounds = array<i64: 8, 256>}, {transform_indices = @transform_1, window_bounds = array<i64: 8, 256>}, {transform_indices = @transform_2, window_bounds = array<i64: 8, 256>}]} {
    %c0 = arith.constant 0 : index
    %c0_0 = arith.constant 0 : index
    %0 = vector.load %arg1[%c0, %c0_0] : memref<8x256xf32, #tpu.memory_space<vmem>>, vector<8x256xf32>
    %c0_1 = arith.constant 0 : index
    %c0_2 = arith.constant 0 : index
    %1 = vector.load %arg2[%c0_1, %c0_2] : memref<8x256xf32, #tpu.memory_space<vmem>>, vector<8x256xf32>
    %cst = arith.constant dense<0.000000e+00> : vector<8xf32>
    %2 = vector.multi_reduction <add>, %0, %cst [1] : vector<8x256xf32> to vector<8xf32>
    %3 = vector.shape_cast %2 : vector<8xf32> to vector<8x1xf32>
    %cst_3 = arith.constant 3.906250e-03 : f32
    %4 = vector.broadcast %cst_3 : f32 to vector<8x1xf32>
    %5 = arith.mulf %3, %4 : vector<8x1xf32>
    %6 = vector.broadcast %5 : vector<8x1xf32> to vector<8x256xf32>
    %7 = arith.subf %0, %6 : vector<8x256xf32>
    %8 = arith.mulf %7, %7 : vector<8x256xf32>
    %cst_4 = arith.constant dense<0.000000e+00> : vector<8xf32>
    %9 = vector.multi_reduction <add>, %8, %cst_4 [1] : vector<8x256xf32> to vector<8xf32>
    %10 = vector.shape_cast %9 : vector<8xf32> to vector<8x1xf32>
    %cst_5 = arith.constant 0.00392156886 : f32
    %11 = vector.broadcast %cst_5 : f32 to vector<8x1xf32>
    %12 = arith.mulf %10, %11 : vector<8x1xf32>
    %13 = math.sqrt %12 : vector<8x1xf32>
    %cst_6 = arith.constant 9.99999974E-6 : f32
    %14 = vector.broadcast %cst_6 : f32 to vector<8x1xf32>
    %15 = arith.addf %13, %14 : vector<8x1xf32>
    %cst_7 = arith.constant dense<0.000000e+00> : vector<8xf32>
    %16 = vector.multi_reduction <add>, %1, %cst_7 [1] : vector<8x256xf32> to vector<8xf32>
    %17 = vector.shape_cast %16 : vector<8xf32> to vector<8x1xf32>
    %cst_8 = arith.constant 3.906250e-03 : f32
    %18 = vector.broadcast %cst_8 : f32 to vector<8x1xf32>
    %19 = arith.mulf %17, %18 : vector<8x1xf32>
    %20 = vector.broadcast %19 : vector<8x1xf32> to vector<8x256xf32>
    %21 = arith.subf %1, %20 : vector<8x256xf32>
    %22 = arith.mulf %21, %21 : vector<8x256xf32>
    %cst_9 = arith.constant dense<0.000000e+00> : vector<8xf32>
    %23 = vector.multi_reduction <add>, %22, %cst_9 [1] : vector<8x256xf32> to vector<8xf32>
    %24 = vector.shape_cast %23 : vector<8xf32> to vector<8x1xf32>
    %cst_10 = arith.constant 0.00392156886 : f32
    %25 = vector.broadcast %cst_10 : f32 to vector<8x1xf32>
    %26 = arith.mulf %24, %25 : vector<8x1xf32>
    %27 = math.sqrt %26 : vector<8x1xf32>
    %cst_11 = arith.constant 9.99999974E-6 : f32
    %28 = vector.broadcast %cst_11 : f32 to vector<8x1xf32>
    %29 = arith.addf %27, %28 : vector<8x1xf32>
    %30 = arith.divf %29, %15 : vector<8x1xf32>
    %31 = arith.mulf %5, %30 : vector<8x1xf32>
    %32 = arith.subf %19, %31 : vector<8x1xf32>
    %33 = vector.broadcast %30 : vector<8x1xf32> to vector<8x256xf32>
    %34 = arith.mulf %0, %33 : vector<8x256xf32>
    %35 = vector.broadcast %32 : vector<8x1xf32> to vector<8x256xf32>
    %36 = arith.addf %34, %35 : vector<8x256xf32>
    %c0_12 = arith.constant 0 : index
    %c0_13 = arith.constant 0 : index
    %37 = vector.load %arg3[%c0_12, %c0_13] : memref<8x256xf32, #tpu.memory_space<vmem>>, vector<8x256xf32>
    tpu.vector_store %arg3[%c0_12, %c0_13], %36 {strides = array<i32>} : memref<8x256xf32, #tpu.memory_space<vmem>>, vector<8x256xf32>,
    return
  }
  func.func @transform_0(%arg0: i32) -> (i32, i32) {
    %c0_i32 = arith.constant 0 : i32
    %c0_i32_0 = arith.constant 0 : i32
    return %arg0, %c0_i32 : i32, i32
  }
  func.func @transform_1(%arg0: i32) -> (i32, i32) {
    %c0_i32 = arith.constant 0 : i32
    %c0_i32_0 = arith.constant 0 : i32
    return %arg0, %c0_i32 : i32, i32
  }
  func.func @transform_2(%arg0: i32) -> (i32, i32) {
    %c0_i32 = arith.constant 0 : i32
    %c0_i32_0 = arith.constant 0 : i32
    return %arg0, %c0_i32 : i32, i32
  }
}

</mosaic_0001>

<bundles_post_ra>
// kernel: tpu_custom_call.1
= control target key start
LH: loop header
LB: loop body
LE: loop exit
PB: predicated region body
PF: predicated region fallthrough
CT: control target
= control target key end

     0   :  { %7 = vsyncpa [#allocation3], 0  ;;  %s241_s0 = inlined_call_operand.hbm [shape: f32[8,256], index: 0, kind: input, shape index: {}]   ;;  %s242_s1 = inlined_call_operand.hbm [shape: f32[8,256], index: 1, kind: input, shape index: {}]   ;;  %s243_s2 = inlined_call_operand.hbm [shape: f32[8,256], index: 2, kind: output, shape index: {}]  }
   0x1   :  { %8 = vsyncpa [#allocation6], 0 }
   0x2   :  { %9 = vsyncpa [#allocation4], 0  ;;  %s187_s9 = smov [#allocation2]   ;;  %s188_s11 = smov [#allocation5]  }
   0x3   :  { %s16_s10 = sshll.u32 %s187_s9, 4  ;;  %s26_s12 = sshll.u32 %s188_s11, 4  ;;  %s17_s10 = int_to_ptr.vmem [resolvable:$true] %s16_s10  ;;  %s27_s12 = int_to_ptr.vmem [resolvable:$true] %s26_s12 }
   0x4   :  { %s115_s15 = scalar_lea.hbm %s241_s0, 256 }
   0x5   :  { %p116_p0 = scmp.ne.s32.totalorder %s241_s0, %s115_s15  ;;  %p119_p1 = scmp.lt.u32.totalorder %s115_s15, %s241_s0 }
   0x7   :  { %p121_p2 = pnand %p119_p1, %p116_p0 }
   0x9   :  { %124 = shalt.err (!%p121_p2)
}
   0xa   :  { %s125_s20 = scalar_lea.vmem %s17_s10, 256  ;;  %p130_p4 = scmp.lt.s32.totalorder %s17_s10, %s17_s10 }
   0xb   :  { %p126_p3 = scmp.ne.s32.totalorder %s17_s10, %s125_s20  ;;  %p131_p5 = scmp.lt.s32.totalorder %s125_s20, %s125_s20 }
   0xd   :  { %p132_p6 = por %p131_p5, %p130_p4 }
   0xf   :  { %p133_p7 = pnand %p132_p6, %p126_p3 }
  0x11   :  { %136 = shalt.err (!%p133_p7)
}
  0x12   :  { %19 = dma.hbm_to_vmem [thread:$0]  %s241_s0, 256, %s17_s10, [#allocation3]  }
  0x13   :  { %s137_s25 = scalar_lea.hbm %s242_s1, 256 }
  0x14   :  { %p138_p8 = scmp.ne.s32.totalorder %s242_s1, %s137_s25  ;;  %p141_p9 = scmp.lt.u32.totalorder %s137_s25, %s242_s1 }
  0x16   :  { %p143_p10 = pnand %p141_p9, %p138_p8 }
  0x18   :  { %146 = shalt.err (!%p143_p10)
}
  0x19   :  { %s147_s30 = scalar_lea.vmem %s27_s12, 256  ;;  %p152_p12 = scmp.lt.s32.totalorder %s27_s12, %s27_s12 }
  0x1a   :  { %p148_p11 = scmp.ne.s32.totalorder %s27_s12, %s147_s30  ;;  %p153_p13 = scmp.lt.s32.totalorder %s147_s30, %s147_s30 }
  0x1c   :  { %p154_p0 = por %p153_p13, %p152_p12 }
  0x1e   :  { %p155_p1 = pnand %p154_p0, %p148_p11 }
  0x20   :  { %158 = shalt.err (!%p155_p1)
}
  0x21   :  { %29 = dma.hbm_to_vmem [thread:$0]  %s242_s1, 256, %s27_s12, [#allocation6]  }
  0x22   :  { %181 = dma.done.wait [#allocation3], 256  }
  0x23   :  { %182 = vsyncadd [#allocation3], 4294967040 }
  0x24   :  { %183 = dma.done.wait [#allocation6], 256  }
  0x25   :  { %184 = vsyncadd [#allocation6], 4294967040  ;;  %v36_v0 = vld [vmem:[#allocation2] sm:$0xff]  ;;  %v37_v1 = vld [vmem:[#allocation2 + $0x8] sm:$0xff]  ;;  %s189_s1 = smov [#allocation7]  }
  0x26   :  { %v38_v2 = vld [vmem:[#allocation5] sm:$0xff]  ;;  %v40_v3 = vadd.f32 %v37_v1, %v36_v0  ;;  %v39_v4 = vld [vmem:[#allocation5 + $0x8] sm:$0xff]  ;;  %s96_s4 = sshll.u32 %s189_s1, 4  ;;  %s97_s4 = int_to_ptr.vmem [resolvable:$true] %s96_s4 }
  0x27   :  { %v60_v5 = vadd.f32 %v39_v4, %v38_v2  ;;  %s159_s5 = scalar_lea.vmem %s97_s4, 256  ;;  %p164_p3 = scmp.lt.s32.totalorder %s97_s4, %s97_s4 }
  0x28   :  { %41 = vadd.xlane.f32.xlu0 %v40_v3  ;;  %p160_p2 = scmp.ne.s32.totalorder %s97_s4, %s159_s5  ;;  %p165_p4 = scmp.lt.s32.totalorder %s159_s5, %s159_s5 }
  0x2a   :  { %p166_p5 = por %p165_p4, %p164_p3 }
  0x2c   :  { %61 = vadd.xlane.f32.xlu0 %v60_v5  ;;  %p167_p6 = pnand %p166_p5, %p160_p2 }
  0xb5   :  { %v42_v6 = vpop.xlane.xlu0 %41 }
  0xb6   :  { %v43_v7 = vmul.f32 0.00390625, %v42_v6 }
  0xb8   :  { %v44_v8 = vsub.f32 %v36_v0, %v43_v7  ;;  %v45_v9 = vsub.f32 %v37_v1, %v43_v7 }
  0xb9   :  { %v62_v10 = vpop.xlane.xlu0 %61 }
  0xba   :  { %v63_v11 = vmul.f32 0.00390625, %v62_v10  ;;  %v46_v12 = vmul.f32 %v44_v8, %v44_v8  ;;  %v47_v13 = vmul.f32 %v45_v9, %v45_v9 }
  0xbc   :  { %v48_v14 = vadd.f32 %v47_v13, %v46_v12  ;;  %v64_v15 = vsub.f32 %v38_v2, %v63_v11  ;;  %v65_v16 = vsub.f32 %v39_v4, %v63_v11 }
  0xbe   :  { %49 = vadd.xlane.f32.xlu1 %v48_v14  ;;  %v66_v17 = vmul.f32 %v64_v15, %v64_v15  ;;  %v67_v18 = vmul.f32 %v65_v16, %v65_v16 }
  0xc0   :  { %v68_v19 = vadd.f32 %v67_v18, %v66_v17 }
  0xc2   :  { %69 = vadd.xlane.f32.xlu1 %v68_v19 }
 0x14b   :  { %v50_v20 = vpop.xlane.xlu1 %49 }
 0x14c   :  { %v51_v21 = vmul.f32 0.003921569, %v50_v20 }
 0x14e   :  { %109 = vrsqrt.f32 %v51_v21  ;;  %vm54_vm0 = vcmp.eq.f32.partialorder %v51_v21, inf  ;;  %v57_v26 = vand.u32 2147483648, %v51_v21  ;;  %vm56_vm1 = vcmp.eq.f32.partialorder %v51_v21, 0.0 }
 0x14f   :  { %v70_v22 = vpop.xlane.xlu1 %69 }
 0x150   :  { %v71_v23 = vmul.f32 0.003921569, %v70_v22 }
 0x152   :  { %111 = vrsqrt.f32 %v71_v23  ;;  %vm74_vm2 = vcmp.eq.f32.partialorder %v71_v23, inf  ;;  %v77_v33 = vand.u32 2147483648, %v71_v23  ;;  %vm76_vm3 = vcmp.eq.f32.partialorder %v71_v23, 0.0 }
 0x158   :  { %v110_v24 = vpop.eup %109 }
 0x159   :  { %v53_v25 = vmul.f32 %v110_v24, %v51_v21 }
 0x15b   :  { %v55_v27 = vsel %vm54_vm0, %v51_v21, %v53_v25 }
 0x15c   :  { %v112_v28 = vpop.eup %111  ;;  %v58_v29 = vsel %vm56_vm1, %v57_v26, %v55_v27 }
 0x15d   :  { %v59_v30 = vadd.f32 1e-05, %v58_v29  ;;  %v73_v31 = vmul.f32 %v112_v28, %v71_v23 }
 0x15f   :  { %113 = vrcp.f32 %v59_v30  ;;  %v75_v32 = vsel %vm74_vm2, %v71_v23, %v73_v31 }
 0x160   :  { %v78_v34 = vsel %vm76_vm3, %v77_v33, %v75_v32 }
 0x161   :  { %v79_v35 = vadd.f32 1e-05, %v78_v34 }
 0x169   :  { %v114_v36 = vpop.eup %113 }
 0x16a   :  { %v81_v37 = vmul.f32 %v114_v36, %v79_v35 }
 0x16c   :  { %v82_v38 = vmul.f32 %v81_v37, %v43_v7  ;;  %v84_v40 = vmul.f32 %v81_v37, %v36_v0  ;;  %v85_v41 = vmul.f32 %v81_v37, %v37_v1 }
 0x16e   :  { %v83_v39 = vsub.f32 %v63_v11, %v82_v38 }
 0x170   :  { %v86_v42 = vadd.f32 %v84_v40, %v83_v39  ;;  %v87_v43 = vadd.f32 %v85_v41, %v83_v39 }
 0x172   :  { %88 = vst [vmem:[#allocation7] sm:$0xff] %v86_v42  ;;  %89 = vst [vmem:[#allocation7 + $0x8] sm:$0xff] %v87_v43 }
 0x173   :  { %170 = shalt.err (!%p167_p6)
}
 0x174   :  { %s171_s8 = scalar_lea.hbm %s243_s2, 256 }
 0x175   :  { %p172_p7 = scmp.ne.s32.totalorder %s243_s2, %s171_s8  ;;  %p175_p8 = scmp.lt.u32.totalorder %s171_s8, %s243_s2 }
 0x177   :  { %p177_p9 = pnand %p175_p8, %p172_p7 }
 0x179   :  { %180 = shalt.err (!%p177_p9)
}
 0x17a   :  { %99 = dma.vmem_to_hbm [thread:$0]  %s97_s4, 256, %s243_s2, [#allocation4]  }
 0x17b   :  { %185 = dma.done.wait [#allocation4], 256  }
 0x17c   :  { %186 = vsyncadd [#allocation4], 4294967040 }
 0x17d   :  { %103 = vsyncpa [#allocation3], 1 }
 0x17e   :  { %104 = vsyncpa [#allocation6], 1 }
 0x17f   :  { %105 = vsyncpa [#allocation4], 1 }

</bundles_post_ra>
